<compile_context>
chip_gen: v5e
topology: v5e:2x2
jax: 0.10.0
libtpu: 0.0.40
codegen_flags: <defaults>
</compile_context>

<pallas_src>
import functools

import jax
import jax.numpy as jnp
from jax.experimental import pallas as pl
from jax.experimental.pallas import tpu as pltpu


_LANES = 128
_TM_CAP = 2048


def _round_up(x, m):
    return (x + m - 1) // m * m


def _choose_tm(batch, tm):
    """Batch tile (lane axis). 128-aligned; >=2 grid steps when batch allows."""
    if tm is not None:
        return _round_up(max(int(tm), _LANES), _LANES)
    b = _round_up(batch, _LANES)
    if b <= _LANES:
        return _LANES                              # tiny batch: one grid step
    # Keep >=2 grid steps (v7x megacore sharding) while amortizing the
    # ~0.35us/step grid overhead with large lane-dense tiles.
    half = _round_up((b + 1) // 2, _LANES)
    return min(_TM_CAP, half)


def _actor_beta_kernel(x_ref, w_ref, b_ref, out_ref, *, Cw, A2p, A2):
    """One batch tile (batch on lanes): fused 3-layer MLP.

    x_ref:   (Cw, TM)            s^T, rows >= state_dim zero-padded
    w_ref:   (2*Cw + A2p, Cw)    rows [0:Cw]=W1, [Cw:2Cw]=W2, [2Cw:2Cw+A2p]=Whead
                                 (each (out, in), zero-padded)
    b_ref:   (2*Cw + A2p, 1)     matching bias columns
    out_ref: (A2, TM)            alpha|beta stacked on sublanes, lane-dense
    """
    x = x_ref[...]                                           # (Cw, TM)
    o2 = 2 * Cw

    h1 = jnp.tanh(
        jnp.dot(w_ref[0:Cw, :], x, preferred_element_type=jnp.float32)
        + b_ref[0:Cw, :]
    )                                                        # (Cw, TM)
    h2 = jnp.tanh(
        jnp.dot(w_ref[Cw:o2, :], h1, preferred_element_type=jnp.float32)
        + b_ref[Cw:o2, :]
    )                                                        # (Cw, TM)
    logits = (
        jnp.dot(w_ref[o2:o2 + A2p, :], h2, preferred_element_type=jnp.float32)
        + b_ref[o2:o2 + A2p, :]
    )                                                        # (A2p, TM)
    # softplus(x) = log(1 + exp(x)) = logaddexp(x, 0)  (numerically stable),
    # applied on a lane-dense (A2p, TM) tile.
    act = jnp.logaddexp(logits, 0.0) + 1.0
    out_ref[...] = act[0:A2, :]                              # unmasked dense store


def pack_actor_beta_params(params):
    """Pack the 8 raw tensors into one weight slab + one bias slab (f32).

    Raw params are stored transposed relative to nn.Linear, i.e. (in, out):
      w1 (S,H), b1 (1,H), w2 (H,H), b2 (1,H), wa (H,A), ba (1,A), wb (H,A), bb (1,A)
    The slab stores them back in (out, in) orientation for the batch-on-lanes
    kernel.
    """
    w1, b1, w2, b2, wa, ba, wb, bb = params
    S, H = w1.shape
    A = wa.shape[1]
    A2 = 2 * A
    Cw = max(_round_up(S, 8), _round_up(H, 8))   # uniform lane width / K dim
    A2p = _round_up(A2, 8)                       # head rows, 8-aligned

    def pad_block(w_out_in, rows, cols):
        return jnp.pad(
            w_out_in,
            ((0, rows - w_out_in.shape[0]), (0, cols - w_out_in.shape[1])),
        )

    wh = jnp.concatenate([wa, wb], axis=1).T                 # (2A, H) fused head
    w_slab = jnp.concatenate(
        [
            pad_block(w1.T, Cw, Cw),                         # (H,S) -> (Cw,Cw)
            pad_block(w2.T, Cw, Cw),                         # (H,H) -> (Cw,Cw)
            pad_block(wh, A2p, Cw),                          # (2A,H) -> (A2p,Cw)
        ],
        axis=0,
    ).astype(jnp.float32)                                    # (2Cw+A2p, Cw)

    def pad_col(b_row, rows):                                # (1,out) -> (rows,1)
        return jnp.pad(b_row.T, ((0, rows - b_row.shape[1]), (0, 0)))

    bh = jnp.concatenate([ba, bb], axis=1)                   # (1, 2A)
    b_slab = jnp.concatenate(
        [pad_col(b1, Cw), pad_col(b2, Cw), pad_col(bh, A2p)], axis=0
    ).astype(jnp.float32)                                    # (2Cw+A2p, 1)

    meta = dict(S=S, H=H, A=A, Cw=Cw, A2p=A2p)
    return w_slab, b_slab, meta


def actor_beta_forward(s, packed, *, tm=None):
    """s: (B, state_dim) f32.  Returns (alpha, beta), each (B, action_dim) f32."""
    w_slab, b_slab, meta = packed
    S, A, Cw, A2p = meta["S"], meta["A"], meta["Cw"], meta["A2p"]
    A2 = 2 * A
    B = s.shape[0]

    TM = _choose_tm(B, tm)
    Bp = _round_up(B, TM)

    # Batch-on-lanes: feed s^T, zero-padded to (Cw, Bp).  Cheap XLA work.
    x = jnp.pad(s.astype(jnp.float32).T, ((0, Cw - S), (0, Bp - B)))

    kernel = functools.partial(_actor_beta_kernel, Cw=Cw, A2p=A2p, A2=A2)
    out = pl.pallas_call(
        kernel,
        out_shape=jax.ShapeDtypeStruct((A2, Bp), jnp.float32),
        grid=(Bp // TM,),
        in_specs=[
            pl.BlockSpec((Cw, TM), lambda i: (0, i)),        # batch-tiled state^T
            pl.BlockSpec(w_slab.shape, lambda i: (0, 0)),    # resident weight slab
            pl.BlockSpec(b_slab.shape, lambda i: (0, 0)),    # resident bias slab
        ],
        out_specs=pl.BlockSpec((A2, TM), lambda i: (0, i)),  # lane-dense alpha|beta
        compiler_params=pltpu.CompilerParams(
            dimension_semantics=("parallel",),               # megacore on v7x
        ),
    )(x, w_slab, b_slab)

    alpha = out[:A, :B].T
    beta = out[A:, :B].T
    return alpha, beta


def orthogonal_weight(key, out_dim, in_dim, gain=1.0):
    """Mimics torch.nn.init.orthogonal_ for a (out_dim, in_dim) Linear weight."""
    rows, cols = max(out_dim, in_dim), min(out_dim, in_dim)
    a = jax.random.normal(key, (rows, cols), dtype=jnp.float32)
    q, r = jnp.linalg.qr(a)
    d = jnp.diag(r)
    q = q * jnp.where(d >= 0, 1.0, -1.0)   # sign fix (robust to d == 0)
    if out_dim < in_dim:
        q = q.T
    return gain * q[:out_dim, :in_dim]


def init_actor_beta_params(key, state_dim, hidden_width, action_dim):
    k1, k2, k3, k4 = jax.random.split(key, 4)
    # nn.Linear weights are (out, in); store transposed (in, out) for the reference.
    w1 = orthogonal_weight(k1, hidden_width, state_dim, gain=1.0).T
    w2 = orthogonal_weight(k2, hidden_width, hidden_width, gain=1.0).T
    wa = orthogonal_weight(k3, action_dim, hidden_width, gain=0.01).T
    wb = orthogonal_weight(k4, action_dim, hidden_width, gain=0.01).T
    b1 = jnp.zeros((1, hidden_width), jnp.float32)
    b2 = jnp.zeros((1, hidden_width), jnp.float32)
    ba = jnp.zeros((1, action_dim), jnp.float32)
    bb = jnp.zeros((1, action_dim), jnp.float32)
    return (w1, b1, w2, b2, wa, ba, wb, bb)


def actor_beta_reference(s, params):
    w1, b1, w2, b2, wa, ba, wb, bb = params
    h1 = jnp.tanh(s @ w1 + b1)
    h2 = jnp.tanh(h1 @ w2 + b2)
    alpha = jax.nn.softplus(h2 @ wa + ba) + 1.0
    beta = jax.nn.softplus(h2 @ wb + bb) + 1.0
    return alpha, beta


if __name__ == "__main__":
    batch, state_dim, hidden_width, action_dim = 8, 16, 32, 4

    key = jax.random.PRNGKey(0)
    k_params, k_state = jax.random.split(key)

    raw_params = init_actor_beta_params(k_params, state_dim, hidden_width, action_dim)
    packed = pack_actor_beta_params(raw_params)
    s = jax.random.normal(k_state, (batch, state_dim), dtype=jnp.float32)

    alpha, beta = actor_beta_forward(s, packed)
    alpha = jax.block_until_ready(alpha)
    beta = jax.block_until_ready(beta)

    alpha_ref, beta_ref = actor_beta_reference(s, raw_params)
    assert alpha.shape == (batch, action_dim) and beta.shape == (batch, action_dim)
    assert jnp.allclose(alpha, alpha_ref, atol=1e-5, rtol=1e-5)
    assert jnp.allclose(beta, beta_ref, atol=1e-5, rtol=1e-5)

    print("KERNEL_OK")
</pallas_src>

<mosaic_0001>
module attributes {stable_mosaic.version = 11 : i64} {
  func.func @_actor_beta_kernel(%arg0: i32, %arg1: memref<32x128xf32, #tpu.memory_space<vmem>>, %arg2: memref<72x32xf32, #tpu.memory_space<vmem>>, %arg3: memref<72x1xf32, #tpu.memory_space<vmem>>, %arg4: memref<8x128xf32, #tpu.memory_space<vmem>>) attributes {dimension_semantics = [#tpu.dimension_semantics<parallel>], iteration_bounds = array<i64: 1>, scalar_prefetch = 0 : i64, scratch_operands = 0 : i64, tpu.core_type = #tpu.core_type<tc>, window_params = [{transform_indices = @transform_0, window_bounds = array<i64: 32, 128>}, {pipeline_mode = #tpu.pipeline_mode<synchronous>, transform_indices = @transform_1, window_bounds = array<i64: 72, 32>}, {pipeline_mode = #tpu.pipeline_mode<synchronous>, transform_indices = @transform_2, window_bounds = array<i64: 72, 1>}, {transform_indices = @transform_3, window_bounds = array<i64: 8, 128>}]} {
    %c0 = arith.constant 0 : index
    %c0_0 = arith.constant 0 : index
    %0 = vector.load %arg1[%c0, %c0_0] : memref<32x128xf32, #tpu.memory_space<vmem>>, vector<32x128xf32>
    %c0_1 = arith.constant 0 : index
    %c0_2 = arith.constant 0 : index
    %1 = vector.load %arg2[%c0_1, %c0_2] : memref<72x32xf32, #tpu.memory_space<vmem>>, vector<32x32xf32>
    %cst = arith.constant dense<0.000000e+00> : vector<32x128xf32>
    %2 = tpu.matmul %1, %0, %cst {dimension_numbers = #tpu.dot_dimension_numbers<[1], [0], [0], [1], [0, 0, 1, 1], [], []>} : vector<32x32xf32>, vector<32x128xf32>, vector<32x128xf32> -> vector<32x128xf32>
    %c0_3 = arith.constant 0 : index
    %c0_4 = arith.constant 0 : index
    %3 = vector.load %arg3[%c0_3, %c0_4] : memref<72x1xf32, #tpu.memory_space<vmem>>, vector<32x1xf32>
    %4 = vector.broadcast %3 : vector<32x1xf32> to vector<32x128xf32>
    %5 = arith.addf %2, %4 : vector<32x128xf32>
    %6 = math.tanh %5 : vector<32x128xf32>
    %c32 = arith.constant 32 : index
    %c0_5 = arith.constant 0 : index
    %7 = vector.load %arg2[%c32, %c0_5] : memref<72x32xf32, #tpu.memory_space<vmem>>, vector<32x32xf32>
    %cst_6 = arith.constant dense<0.000000e+00> : vector<32x128xf32>
    %8 = tpu.matmul %7, %6, %cst_6 {dimension_numbers = #tpu.dot_dimension_numbers<[1], [0], [0], [1], [0, 0, 1, 1], [], []>} : vector<32x32xf32>, vector<32x128xf32>, vector<32x128xf32> -> vector<32x128xf32>
    %c32_7 = arith.constant 32 : index
    %c0_8 = arith.constant 0 : index
    %9 = vector.load %arg3[%c32_7, %c0_8] : memref<72x1xf32, #tpu.memory_space<vmem>>, vector<32x1xf32>
    %10 = vector.broadcast %9 : vector<32x1xf32> to vector<32x128xf32>
    %11 = arith.addf %8, %10 : vector<32x128xf32>
    %12 = math.tanh %11 : vector<32x128xf32>
    %c64 = arith.constant 64 : index
    %c0_9 = arith.constant 0 : index
    %13 = vector.load %arg2[%c64, %c0_9] : memref<72x32xf32, #tpu.memory_space<vmem>>, vector<8x32xf32>
    %cst_10 = arith.constant dense<0.000000e+00> : vector<8x128xf32>
    %14 = tpu.matmul %13, %12, %cst_10 {dimension_numbers = #tpu.dot_dimension_numbers<[1], [0], [0], [1], [0, 0, 1, 1], [], []>} : vector<8x32xf32>, vector<32x128xf32>, vector<8x128xf32> -> vector<8x128xf32>
    %c64_11 = arith.constant 64 : index
    %c0_12 = arith.constant 0 : index
    %15 = vector.load %arg3[%c64_11, %c0_12] : memref<72x1xf32, #tpu.memory_space<vmem>>, vector<8x1xf32>
    %16 = vector.broadcast %15 : vector<8x1xf32> to vector<8x128xf32>
    %17 = arith.addf %14, %16 : vector<8x128xf32>
    %cst_13 = arith.constant 0.000000e+00 : f32
    %18 = vector.broadcast %cst_13 : f32 to vector<8x128xf32>
    %19 = arith.maximumf %17, %18 : vector<8x128xf32>
    %20 = vector.broadcast %cst_13 : f32 to vector<8x128xf32>
    %21 = arith.subf %17, %20 : vector<8x128xf32>
    %22 = arith.cmpf one, %21, %21 : vector<8x128xf32>
    %23 = vector.broadcast %cst_13 : f32 to vector<8x128xf32>
    %24 = arith.addf %17, %23 : vector<8x128xf32>
    %25 = math.absf %21 : vector<8x128xf32>
    %cst_14 = arith.constant 0.000000e+00 : f32
    %26 = vector.broadcast %cst_14 : f32 to vector<8x128xf32>
    %27 = arith.subf %26, %25 : vector<8x128xf32>
    %28 = math.exp %27 : vector<8x128xf32>
    %29 = math.log1p %28 : vector<8x128xf32>
    %30 = arith.addf %19, %29 : vector<8x128xf32>
    %31 = arith.select %22, %24, %30 : vector<8x128xi1>, vector<8x128xf32>
    %cst_15 = arith.constant 1.000000e+00 : f32
    %32 = vector.broadcast %cst_15 : f32 to vector<8x128xf32>
    %33 = arith.addf %31, %32 : vector<8x128xf32>
    %c0_16 = arith.constant 0 : index
    %c0_17 = arith.constant 0 : index
    %34 = vector.load %arg4[%c0_16, %c0_17] : memref<8x128xf32, #tpu.memory_space<vmem>>, vector<8x128xf32>
    tpu.vector_store %arg4[%c0_16, %c0_17], %33 {strides = array<i32>} : memref<8x128xf32, #tpu.memory_space<vmem>>, vector<8x128xf32>,
    return
  }
  func.func @transform_0(%arg0: i32) -> (i32, i32) {
    %c0_i32 = arith.constant 0 : i32
    %c0_i32_0 = arith.constant 0 : i32
    return %c0_i32, %arg0 : i32, i32
  }
  func.func @transform_1(%arg0: i32) -> (i32, i32) {
    %c0_i32 = arith.constant 0 : i32
    %c0_i32_0 = arith.constant 0 : i32
    %c0_i32_1 = arith.constant 0 : i32
    return %c0_i32, %c0_i32_0 : i32, i32
  }
  func.func @transform_2(%arg0: i32) -> (i32, i32) {
    %c0_i32 = arith.constant 0 : i32
    %c0_i32_0 = arith.constant 0 : i32
    %c0_i32_1 = arith.constant 0 : i32
    return %c0_i32, %c0_i32_0 : i32, i32
  }
  func.func @transform_3(%arg0: i32) -> (i32, i32) {
    %c0_i32 = arith.constant 0 : i32
    %c0_i32_0 = arith.constant 0 : i32
    return %c0_i32, %arg0 : i32, i32
  }
}

</mosaic_0001>

<bundles_post_ra>
// kernel: tpu_custom_call.1
= control target key start
LH: loop header
LB: loop body
LE: loop exit
PB: predicated region body
PF: predicated region fallthrough
CT: control target
= control target key end

     0   :  { %v300_v2 = vmov 0   ;;  %s400_s0 = inlined_call_operand.vmem [shape: f32[32,128], index: 0, kind: input, shape index: {}]   ;;  %s401_s1 = inlined_call_operand.vmem [shape: f32[72,32], index: 1, kind: input, shape index: {}]   ;;  %s402_s2 = inlined_call_operand.vmem [shape: f32[72,1], index: 2, kind: input, shape index: {}]   ;;  %s403_s3 = inlined_call_operand.hbm [shape: f32[8,128], index: 3, kind: output, shape index: {}]  }
   0x1   :  { %v18_v0 = vld [vmem:[%s400_s0 + $0x18] sm:$0xff]  ;;  %v17_v1 = vld [vmem:[%s400_s0 + $0x10] sm:$0xff]  ;;  %251 = vset.pattern.permute.xlu0 %v300_v2  ;;  %v16_v3 = vld [vmem:[%s400_s0 + $0x8] sm:$0xff]  ;;  %252 = vset.pattern.permute.xlu1 %v300_v2 }
   0x2   :  { %241 = vmatpush.msra.mxu3 %v18_v0  ;;  %v26_v4 = vld [vmem:[%s402_s2 + $0x18] sm:$0xff]  ;;  %72 = vmatpush.msra.mxu0 %v18_v0  ;;  %v24_v5 = vld [vmem:[%s402_s2 + $0x8] sm:$0xff]  ;;  %v15_v6 = vld [vmem:[%s400_s0] sm:$0xff] }
   0x3   :  { %44 = vperm.xlu0 %251, %v26_v4   ;;  %34 = vperm.xlu1 %252, %v24_v5  }
   0x4   :  { %242 = vmatpush.msra.mxu3 %v17_v1  ;;  %73 = vmatpush.msra.mxu0 %v17_v1 }
   0x5   :  { %8 = vsyncpa [#allocation3], 0  ;;  %v20_v7 = vld [vmem:[%s401_s1 + $0x8] sm:$0xff]  ;;  %vm47_vm0 = vcmask 261120   ;;  %253 = vset.pattern.permute.xlu2 %v300_v2  ;;  %v19_v8 = vld [vmem:[%s401_s1] sm:$0xff]  ;;  %s223_s29 = sshll.u32 %s403_s3, 4  ;;  %s224_s29 = int_to_ptr.hbm [resolvable:$true] %s223_s29 }
   0x6   :  { %243 = vmatpush.msra.mxu3 %v16_v3  ;;  %74 = vmatpush.msra.mxu0 %v16_v3  ;;  %v25_v9 = vld [vmem:[%s402_s2 + $0x10] sm:$0xff]  ;;  %v23_v10 = vld [vmem:[%s402_s2] sm:$0xff]  ;;  %v98_v12 = vld [vmem:[%s402_s2 + $0x28] sm:$0xff] }
   0x7   :  { %v21_v11 = vld [vmem:[%s401_s1 + $0x10] sm:$0xff]  ;;  %v97_v13 = vld [vmem:[%s402_s2 + $0x20] sm:$0xff]  ;;  %v22_v14 = vld [vmem:[%s401_s1 + $0x18] sm:$0xff] }
   0x8   :  { %244 = vmatpush.msra.mxu3 %v15_v6  ;;  %75 = vmatpush.msra.mxu0 %v15_v6  ;;  %v100_v23 = vld [vmem:[%s402_s2 + $0x38] sm:$0xff]  ;;  %v99_v28 = vld [vmem:[%s402_s2 + $0x30] sm:$0xff]  ;;  %v93_v32 = vld [vmem:[%s401_s1 + $0x20] sm:$0xff] }
   0x9   :  { %233 = vmatmul.msk.f32.vlgmr.msra.gmra.mxu3 %vm47_vm0, %v20_v7  ;;  %232 = vmatmul.msk.f32.vlgmr.msra.gmra.mxu0 %vm47_vm0, %v19_v8  ;;  %v94_v33 = vld [vmem:[%s401_s1 + $0x28] sm:$0xff]  ;;  %v167_v35 = vld [vmem:[%s402_s2 + $0x40] sm:$0xff]  ;;  %v95_v36 = vld [vmem:[%s401_s1 + $0x30] sm:$0xff] }
   0xa   :  { %118 = vperm.xlu2 %253, %v100_v23   ;;  %v96_v37 = vld [vmem:[%s401_s1 + $0x38] sm:$0xff]  ;;  %v166_v53 = vld [vmem:[%s401_s1 + $0x40] sm:$0xff]  ;;  %s301_s1 = smov [#allocation2]  }
   0xb   :  { %39 = vperm.xlu0 %251, %v25_v9   ;;  %29 = vperm.xlu1 %252, %v23_v10   ;;  %s221_s27 = sshll.u32 %s301_s1, 4  ;;  %s222_s27 = int_to_ptr.vmem [resolvable:$true] %s221_s27 }
  0x11   :  { %234 = vmatmul.msk.f32.gmra.mxu3 %vm47_vm0, %v21_v11 }
  0x12   :  { %113 = vperm.xlu2 %253, %v99_v28  }
  0x13   :  { %108 = vperm.xlu0 %251, %v98_v12   ;;  %103 = vperm.xlu1 %252, %v97_v13  }
  0x19   :  { %235 = vmatmul.msk.f32.gmra.mxu3 %vm47_vm0, %v22_v14 }
  0x1a   :  { %170 = vperm.xlu2 %253, %v167_v35  }
  0x64   :  { %v119_v39 = vpop.permute.xlu2 %118 }
  0x6c   :  { %v114_v41 = vpop.permute.xlu2 %113 }
  0x74   :  { %v171_v55 = vpop.permute.xlu2 %170 }
  0x75   :  { %v45_v16 = vpop.permute.xlu0 %44  ;;  %v35_v18 = vpop.permute.xlu1 %34 }
  0x7d   :  { %v40_v19 = vpop.permute.xlu0 %39  ;;  %v30_v26 = vpop.permute.xlu1 %29 }
  0x85   :  { %v109_v45 = vpop.permute.xlu0 %108  ;;  %v104_v48 = vpop.permute.xlu1 %103 }
  0x86   :  { %v77_v24 = vpop.f32.mrf.mxu0 }
  0x87   :  { %v78_v27 = vadd.f32 %v77_v24, %v30_v26 }
  0x8c   :  { %v80_v15 = vpop.f32.mrf.mxu3 }
  0x8d   :  { %v81_v25 = vadd.f32 %v80_v15, %v35_v18 }
  0x94   :  { %v83_v17 = vpop.f32.mrf.mxu3 }
  0x95   :  { %v84_v21 = vadd.f32 %v83_v17, %v40_v19 }
  0x9c   :  { %v86_v20 = vpop.f32.mrf.mxu3 }
  0x9d   :  { %v87_v22 = vadd.f32 %v86_v20, %v45_v16 }
  0x9f   :  { %254 = vtanh.f32 %v87_v22 }
  0xa0   :  { %256 = vtanh.f32 %v84_v21 }
  0xa1   :  { %258 = vtanh.f32 %v81_v25 }
  0xa2   :  { %260 = vtanh.f32 %v78_v27 }
  0xa5   :  { %v255_v29 = vpop.eup %254 }
  0xa6   :  { %145 = vmatpush.msrb.mxu0 %v255_v29  ;;  %245 = vmatpush.msra.mxu1 %v255_v29  ;;  %v257_v30 = vpop.eup %256 }
  0xa7   :  { %v259_v31 = vpop.eup %258 }
  0xa8   :  { %146 = vmatpush.msrb.mxu0 %v257_v30  ;;  %246 = vmatpush.msra.mxu1 %v257_v30  ;;  %v261_v34 = vpop.eup %260 }
  0xaa   :  { %147 = vmatpush.msrb.mxu0 %v259_v31  ;;  %247 = vmatpush.msra.mxu1 %v259_v31 }
  0xac   :  { %148 = vmatpush.msrb.mxu0 %v261_v34  ;;  %248 = vmatpush.msra.mxu1 %v261_v34 }
  0xad   :  { %236 = vmatmul.msk.f32.vlgmr.msrb.gmra.mxu0 %vm47_vm0, %v93_v32  ;;  %237 = vmatmul.msk.f32.vlgmr.msra.gmra.mxu1 %vm47_vm0, %v94_v33 }
  0xb5   :  { %238 = vmatmul.msk.f32.gmra.mxu1 %vm47_vm0, %v95_v36 }
  0xbd   :  { %239 = vmatmul.msk.f32.gmra.mxu1 %vm47_vm0, %v96_v37 }
 0x12a   :  { %v153_v38 = vpop.f32.mrf.mxu1  ;;  %v150_v46 = vpop.f32.mrf.mxu0 }
 0x12b   :  { %v154_v47 = vadd.f32 %v153_v38, %v109_v45  ;;  %v151_v49 = vadd.f32 %v150_v46, %v104_v48 }
 0x132   :  { %v156_v40 = vpop.f32.mrf.mxu1 }
 0x133   :  { %v157_v43 = vadd.f32 %v156_v40, %v114_v41 }
 0x13a   :  { %v159_v42 = vpop.f32.mrf.mxu1 }
 0x13b   :  { %v160_v44 = vadd.f32 %v159_v42, %v119_v39 }
 0x13d   :  { %262 = vtanh.f32 %v160_v44 }
 0x13e   :  { %264 = vtanh.f32 %v157_v43 }
 0x13f   :  { %266 = vtanh.f32 %v154_v47 }
 0x140   :  { %268 = vtanh.f32 %v151_v49 }
 0x143   :  { %v263_v50 = vpop.eup %262 }
 0x144   :  { %188 = vmatpush.msra.mxu2 %v263_v50  ;;  %v265_v51 = vpop.eup %264 }
 0x145   :  { %v267_v52 = vpop.eup %266 }
 0x146   :  { %189 = vmatpush.msra.mxu2 %v265_v51  ;;  %v269_v54 = vpop.eup %268 }
 0x148   :  { %190 = vmatpush.msra.mxu2 %v267_v52 }
 0x14a   :  { %191 = vmatpush.msra.mxu2 %v269_v54 }
 0x14b   :  { %240 = vmatmul.msk.f32.vlgmr.msra.gmra.mxu2 %vm47_vm0, %v166_v53 }
 0x1ce   :  { %v193_v56 = vpop.f32.mrf.mxu2 }
 0x1cf   :  { %v194_v57 = vadd.f32 %v193_v56, %v171_v55 }
 0x1d1   :  { %v199_v58 = vand.u32 2147483647, %v194_v57  ;;  %v196_v5 = vmax.f32 %v194_v57, 0.0  ;;  %vm197_vm2 = vcmp.ne.f32.partialorder %v194_v57, %v194_v57 }
 0x1d3   :  { %v200_v59 = vsub.f32 0.0, %v199_v58 }
 0x1d5   :  { %v201_v60 = vmul.f32 1.442695, %v200_v59 }
 0x1d7   :  { %270 = vpow2.f32 %v201_v60 }
 0x1dd   :  { %v271_v61 = vpop.eup %270 }
 0x1de   :  { %v203_v62 = vadd.f32 1.0, %v271_v61  ;;  %v206_v63 = vmul.f32 -0.5, %v271_v61  ;;  %v209_v1 = vand.u32 2147483647, %v271_v61 }
 0x1e0   :  { %272 = vlog2.f32 %v203_v62  ;;  %v207_v0 = vadd.f32 1.0, %v206_v63  ;;  %vm210_vm1 = vcmp.lt.f32.partialorder %v209_v1, 0.0004427343 }
 0x1e2   :  { %v208_v4 = vmul.f32 %v271_v61, %v207_v0 }
 0x1e6   :  { %v273_v2 = vpop.eup %272 }
 0x1e7   :  { %v205_v3 = vmul.f32 0.6931472, %v273_v2 }
 0x1e9   :  { %v211_v6 = vsel %vm210_vm1, %v208_v4, %v205_v3 }
 0x1ea   :  { %v212_v7 = vadd.f32 %v211_v6, %v196_v5 }
 0x1ec   :  { %v213_v8 = vsel %vm197_vm2, %v194_v57, %v212_v7 }
 0x1ed   :  { %v214_v9 = vadd.f32 1.0, %v213_v8 }
 0x1ef   :  { %215 = vst [vmem:[#allocation2] sm:$0xff] %v214_v9 }
 0x1f0   :  { %226 = dma.vmem_to_hbm [thread:$0]  %s222_s27, 128, %s224_s29, [#allocation3]  }
 0x1f1   :  { %298 = dma.done.wait [#allocation3], 128  }
 0x1f2   :  { %299 = vsyncadd [#allocation3], 4294967168 }
 0x1f3   :  { %231 = vsyncpa [#allocation3], 1 }

</bundles_post_ra>
